<compile_context>
chip_gen: v7x
topology: tpu7x:2x2x1
jax: 0.10.0
libtpu: 0.0.40
codegen_flags: <defaults>
</compile_context>

<pallas_src>
import functools

import jax
import jax.numpy as jnp
from jax.experimental import pallas as pl
from jax.experimental.pallas import tpu as pltpu


def _round_up(a: int, b: int) -> int:
    return (a + b - 1) // b * b


def _maxout_kernel(x_ref, w_ref, b_ref, o_ref, acc_ref, *, k_groups: int, tn: int):
    """Fused matmul + bias + max-over-groups, accumulated over the F_in grid axis.

    x_ref   : (tm, tk)           VMEM  input tile
    w_ref   : (tk, K*tn)         VMEM  fused weight tile (K groups side-by-side)
    b_ref   : (1, 1, K*tn)       VMEM  fused bias for this output tile (f32)
    o_ref   : (tm, tn)           VMEM  output tile
    acc_ref : (tm, K*tn) f32     VMEM  scratch accumulator (resident over kr)
    """
    kr = pl.program_id(2)

    @pl.when(kr == 0)
    def _():
        acc_ref[...] = jnp.zeros_like(acc_ref)

    # One large MXU matmul covering all K groups at once (N = K*tn, lane-dense).
    acc_ref[...] += jnp.dot(
        x_ref[...], w_ref[...], preferred_element_type=jnp.float32
    )

    @pl.when(kr == pl.num_programs(2) - 1)
    def _():
        # Single broadcast + add for the bias (hoisted out of any per-group loop).
        y = acc_ref[...] + b_ref[0]
        # Fold the max over K lane-aligned slices (cheap VPU work).
        m = y[:, 0:tn]
        for k in range(1, k_groups):
            m = jnp.maximum(m, y[:, k * tn:(k + 1) * tn])
        o_ref[...] = m.astype(o_ref.dtype)


def maxout(x: jax.Array, w: jax.Array, b: jax.Array,
           *, tm: int = 128, tn: int = 128, tk: int = 256,
           compute_dtype=None) -> jax.Array:
    """x: (B, F_in), w: (K, F_in, F_out), b: (K, F_out) -> (B, F_out).

    Pass bf16 (or set compute_dtype=jnp.bfloat16) to use the bf16 MXU path
    on v6e/v7x; accumulation is always float32.
    """
    batch, in_features = x.shape
    k_groups, in_features_w, out_features = w.shape
    assert in_features_w == in_features
    assert b.shape == (k_groups, out_features)

    # --- tile sizes: tn, tk multiples of 128 (lane-dense); tm multiple of 8 ---
    tm = min(tm, _round_up(batch, 8))
    tn = min(tn, _round_up(out_features, 128))
    tk = min(tk, _round_up(in_features, 128))

    b_p = _round_up(batch, tm)
    f_out_p = _round_up(out_features, tn)
    f_in_p = _round_up(in_features, tk)
    n_j = f_out_p // tn
    n_i = b_p // tm
    n_k = f_in_p // tk

    out_dtype = x.dtype
    if compute_dtype is None:
        compute_dtype = x.dtype

    # --- zero-pad to tile multiples (zeros are neutral for matmul; padded
    #     output rows/cols are sliced off below) ---
    x_p = jnp.pad(x, ((0, b_p - batch), (0, f_in_p - in_features))).astype(compute_dtype)
    w_p = jnp.pad(w, ((0, 0), (0, f_in_p - in_features), (0, f_out_p - out_features)))
    b_pd = jnp.pad(b, ((0, 0), (0, f_out_p - out_features)))

    # Fused weight layout: column index = (j * K + k) * tn + t, so output tile j
    # reads one contiguous (tk, K*tn) slab that contains all K groups.
    w_fused = (
        w_p.reshape(k_groups, f_in_p, n_j, tn)
        .transpose(1, 2, 0, 3)
        .reshape(f_in_p, n_j * k_groups * tn)
        .astype(compute_dtype)
    )
    # Matching fused bias: (n_j, 1, K*tn), kept in f32 for the epilogue.
    b_fused = (
        b_pd.reshape(k_groups, n_j, tn)
        .transpose(1, 0, 2)
        .reshape(n_j, 1, k_groups * tn)
        .astype(jnp.float32)
    )

    kernel = functools.partial(_maxout_kernel, k_groups=k_groups, tn=tn)

    flops = 2 * b_p * f_in_p * k_groups * f_out_p
    bytes_accessed = (
        x_p.size * x_p.dtype.itemsize
        + w_fused.size * w_fused.dtype.itemsize
        + b_fused.size * 4
        + b_p * f_out_p * jnp.dtype(out_dtype).itemsize
    )

    out_p = pl.pallas_call(
        kernel,
        out_shape=jax.ShapeDtypeStruct((b_p, f_out_p), out_dtype),
        grid_spec=pltpu.PrefetchScalarGridSpec(
            num_scalar_prefetch=0,
            # out_features axis first (parallel), batch second (parallel),
            # F_in reduction last (arbitrary, accumulator-resident).
            grid=(n_j, n_i, n_k),
            in_specs=[
                pl.BlockSpec((tm, tk), lambda j, i, kr: (i, kr)),
                pl.BlockSpec((tk, k_groups * tn), lambda j, i, kr: (kr, j)),
                pl.BlockSpec((1, 1, k_groups * tn), lambda j, i, kr: (j, 0, 0)),
            ],
            out_specs=pl.BlockSpec((tm, tn), lambda j, i, kr: (i, j)),
            scratch_shapes=[pltpu.VMEM((tm, k_groups * tn), jnp.float32)],
        ),
        compiler_params=pltpu.CompilerParams(
            dimension_semantics=("parallel", "parallel", "arbitrary"),
            # Explicit budget; tiles above fit comfortably under v7x's 64 MiB.
            vmem_limit_bytes=64 * 1024 * 1024,
        ),
        cost_estimate=pl.CostEstimate(
            flops=flops, transcendentals=0, bytes_accessed=bytes_accessed
        ),
    )(x_p, w_fused, b_fused)

    return out_p[:batch, :out_features]


def maxout_reference(x, w, b):
    # (B, F_in) @ (K, F_in, F_out) -> (K, B, F_out); + bias; max over K.
    y = jnp.einsum("bf,kfo->kbo", x, w) + b[:, None, :]
    return jnp.max(y, axis=0)


if __name__ == "__main__":
    key = jax.random.PRNGKey(0)

    def make_inputs(k, batch, in_features, out_features, k_groups):
        kx, kw, kb = jax.random.split(k, 3)
        bound = 1.0 / (in_features ** 0.5)
        x = jax.random.normal(kx, (batch, in_features), dtype=jnp.float32)
        w = jax.random.uniform(kw, (k_groups, in_features, out_features),
                               minval=-bound, maxval=bound, dtype=jnp.float32)
        b = jax.random.uniform(kb, (k_groups, out_features),
                               minval=-bound, maxval=bound, dtype=jnp.float32)
        return x, w, b

    k1, k2 = jax.random.split(key)

    # 1) Shapes implied by the module (batch=8, in=32, out=16, K=4): single-tile grid.
    x, w, b = make_inputs(k1, 8, 32, 16, 4)
    out = jax.block_until_ready(maxout(x, w, b))
    ref = maxout_reference(x, w, b)
    assert out.shape == (8, 16)
    assert jnp.allclose(out, ref, atol=1e-5, rtol=1e-5), "mismatch vs reference (small)"

    # 2) A shape that exercises the padded, multi-tile (2,2,3) grid — still small.
    x, w, b = make_inputs(k2, 24, 300, 200, 3)
    out = jax.block_until_ready(maxout(x, w, b, tm=16, tn=128, tk=128))
    ref = maxout_reference(x, w, b)
    assert out.shape == (24, 200)
    assert jnp.allclose(out, ref, atol=1e-4, rtol=1e-4), "mismatch vs reference (tiled)"

    print("KERNEL_OK")
</pallas_src>

<mosaic_0001>
module attributes {stable_mosaic.version = 11 : i64} {
  func.func @_maxout_kernel(%arg0: i32, %arg1: i32, %arg2: i32, %arg3: memref<8x128xf32, #tpu.memory_space<vmem>>, %arg4: memref<128x512xf32, #tpu.memory_space<vmem>>, %arg5: memref<1x1x512xf32, #tpu.memory_space<vmem>>, %arg6: memref<8x128xf32, #tpu.memory_space<vmem>>, %arg7: memref<8x512xf32, #tpu.memory_space<vmem>>) attributes {dimension_semantics = [#tpu.dimension_semantics<parallel>, #tpu.dimension_semantics<parallel>, #tpu.dimension_semantics<arbitrary>], iteration_bounds = array<i64: 1, 1, 1>, scalar_prefetch = 0 : i64, scratch_operands = 1 : i64, tpu.core_type = #tpu.core_type<tc>, window_params = [{transform_indices = @transform_0, window_bounds = array<i64: 8, 128>}, {transform_indices = @transform_1, window_bounds = array<i64: 128, 512>}, {transform_indices = @transform_2, window_bounds = array<i64: 1, 1, 512>}, {transform_indices = @transform_3, window_bounds = array<i64: 8, 128>}]} {
    %c0_i32 = arith.constant 0 : i32
    %0 = arith.cmpi eq, %arg2, %c0_i32 : i32
    %1 = arith.extui %0 : i1 to i32
    %c0_i32_0 = arith.constant 0 : i32
    %2 = arith.cmpi ne, %1, %c0_i32_0 : i32
    scf.if %2 {
      %cst_10 = arith.constant 0.000000e+00 : f32
      %12 = vector.broadcast %cst_10 : f32 to vector<8x512xf32>
      %c0_11 = arith.constant 0 : index
      %c0_12 = arith.constant 0 : index
      %13 = vector.load %arg7[%c0_11, %c0_12] : memref<8x512xf32, #tpu.memory_space<vmem>>, vector<8x512xf32>
      tpu.vector_store %arg7[%c0_11, %c0_12], %12 {strides = array<i32>} : memref<8x512xf32, #tpu.memory_space<vmem>>, vector<8x512xf32>,
    } else {
    }
    %c0 = arith.constant 0 : index
    %c0_1 = arith.constant 0 : index
    %3 = vector.load %arg7[%c0, %c0_1] : memref<8x512xf32, #tpu.memory_space<vmem>>, vector<8x512xf32>
    %c0_2 = arith.constant 0 : index
    %c0_3 = arith.constant 0 : index
    %4 = vector.load %arg3[%c0_2, %c0_3] : memref<8x128xf32, #tpu.memory_space<vmem>>, vector<8x128xf32>
    %c0_4 = arith.constant 0 : index
    %c0_5 = arith.constant 0 : index
    %5 = vector.load %arg4[%c0_4, %c0_5] : memref<128x512xf32, #tpu.memory_space<vmem>>, vector<128x512xf32>
    %cst = arith.constant dense<0.000000e+00> : vector<8x512xf32>
    %6 = tpu.matmul %4, %5, %cst {dimension_numbers = #tpu.dot_dimension_numbers<[1], [0], [0], [1], [0, 0, 1, 1], [], []>} : vector<8x128xf32>, vector<128x512xf32>, vector<8x512xf32> -> vector<8x512xf32>
    %7 = arith.addf %3, %6 : vector<8x512xf32>
    %c0_6 = arith.constant 0 : index
    %c0_7 = arith.constant 0 : index
    %8 = vector.load %arg7[%c0_6, %c0_7] : memref<8x512xf32, #tpu.memory_space<vmem>>, vector<8x512xf32>
    tpu.vector_store %arg7[%c0_6, %c0_7], %7 {strides = array<i32>} : memref<8x512xf32, #tpu.memory_space<vmem>>, vector<8x512xf32>,
    %c0_i32_8 = arith.constant 0 : i32
    %9 = arith.cmpi eq, %arg2, %c0_i32_8 : i32
    %10 = arith.extui %9 : i1 to i32
    %c0_i32_9 = arith.constant 0 : i32
    %11 = arith.cmpi ne, %10, %c0_i32_9 : i32
    scf.if %11 {
      %c0_10 = arith.constant 0 : index
      %c0_11 = arith.constant 0 : index
      %12 = vector.load %arg7[%c0_10, %c0_11] : memref<8x512xf32, #tpu.memory_space<vmem>>, vector<8x512xf32>
      %c0_12 = arith.constant 0 : index
      %c0_13 = arith.constant 0 : index
      %c0_14 = arith.constant 0 : index
      %13 = vector.load %arg5[%c0_12, %c0_13, %c0_14] : memref<1x1x512xf32, #tpu.memory_space<vmem>>, vector<1x1x512xf32>
      %14 = vector.shape_cast %13 : vector<1x1x512xf32> to vector<1x512xf32>
      %15 = vector.broadcast %14 : vector<1x512xf32> to vector<8x512xf32>
      %16 = arith.addf %12, %15 : vector<8x512xf32>
      %17 = vector.extract_strided_slice %16 {offsets = [0, 0], sizes = [8, 128], strides = [1, 1]} : vector<8x512xf32> to vector<8x128xf32>
      %18 = vector.extract_strided_slice %16 {offsets = [0, 128], sizes = [8, 128], strides = [1, 1]} : vector<8x512xf32> to vector<8x128xf32>
      %19 = arith.maximumf %17, %18 : vector<8x128xf32>
      %20 = vector.extract_strided_slice %16 {offsets = [0, 256], sizes = [8, 128], strides = [1, 1]} : vector<8x512xf32> to vector<8x128xf32>
      %21 = arith.maximumf %19, %20 : vector<8x128xf32>
      %22 = vector.extract_strided_slice %16 {offsets = [0, 384], sizes = [8, 128], strides = [1, 1]} : vector<8x512xf32> to vector<8x128xf32>
      %23 = arith.maximumf %21, %22 : vector<8x128xf32>
      %c0_15 = arith.constant 0 : index
      %c0_16 = arith.constant 0 : index
      %24 = vector.load %arg6[%c0_15, %c0_16] : memref<8x128xf32, #tpu.memory_space<vmem>>, vector<8x128xf32>
      tpu.vector_store %arg6[%c0_15, %c0_16], %23 {strides = array<i32>} : memref<8x128xf32, #tpu.memory_space<vmem>>, vector<8x128xf32>,
    } else {
    }
    return
  }
  func.func @transform_0(%arg0: i32, %arg1: i32, %arg2: i32) -> (i32, i32) {
    %c0_i32 = arith.constant 0 : i32
    return %arg1, %arg2 : i32, i32
  }
  func.func @transform_1(%arg0: i32, %arg1: i32, %arg2: i32) -> (i32, i32) {
    %c0_i32 = arith.constant 0 : i32
    return %arg2, %arg0 : i32, i32
  }
  func.func @transform_2(%arg0: i32, %arg1: i32, %arg2: i32) -> (i32, i32, i32) {
    %c0_i32 = arith.constant 0 : i32
    %c0_i32_0 = arith.constant 0 : i32
    %c0_i32_1 = arith.constant 0 : i32
    return %arg0, %c0_i32, %c0_i32_0 : i32, i32, i32
  }
  func.func @transform_3(%arg0: i32, %arg1: i32, %arg2: i32) -> (i32, i32) {
    %c0_i32 = arith.constant 0 : i32
    return %arg1, %arg0 : i32, i32
  }
}

</mosaic_0001>

<bundles_post_ra>
// kernel: tpu_custom_call.1
= control target key start
LH: loop header
LB: loop body
LE: loop exit
PB: predicated region body
PF: predicated region fallthrough
CT: control target
= control target key end

     0   :  { %8 = vsyncpa [#allocation4], 0  ;;  %s572_s0 = inlined_call_operand.hbm [shape: f32[8,128], index: 0, kind: input, shape index: {}]   ;;  %s573_s1 = inlined_call_operand.hbm [shape: f32[128,512], index: 1, kind: input, shape index: {}]   ;;  %s574_s2 = inlined_call_operand.hbm [shape: f32[1,1,512], index: 2, kind: input, shape index: {}]   ;;  %s575_s3 = inlined_call_operand.hbm [shape: f32[8,128], index: 3, kind: output, shape index: {}]  }
   0x1   :  { %9 = vsyncpa [#allocation7], 0 }
   0x2   :  { %10 = vsyncpa [#allocation5], 0  ;;  %s497_s12 = smov [#allocation6]   ;;  %s403_s16 = scalar_lea.hbm %s573_s1, 8192 }
   0x3   :  { %s26_s13 = sshll.u32 %s497_s12, 4  ;;  %p404_p0 = scmp.ne.s32.totalorder %s573_s1, %s403_s16  ;;  %s27_s13 = int_to_ptr.vmem [resolvable:$true] %s26_s13 }
   0x4   :  { %p407_p1 = scmp.lt.u32.totalorder %s403_s16, %s573_s1 }
   0x6   :  { %p409_p2 = pnand %p407_p1, %p404_p0 }
   0x8   :  { %412 = shalt.err (!%p409_p2)
}
   0x9   :  { %s413_s21 = scalar_lea.vmem %s27_s13, 8192  ;;  %p418_p4 = scmp.lt.s32.totalorder %s27_s13, %s27_s13 }
   0xa   :  { %p414_p3 = scmp.ne.s32.totalorder %s27_s13, %s413_s21  ;;  %p419_p5 = scmp.lt.s32.totalorder %s413_s21, %s413_s21 }
   0xc   :  { %p420_p6 = por %p419_p5, %p418_p4 }
   0xe   :  { %p421_p7 = pnand %p420_p6, %p414_p3 }
  0x10   :  { %424 = shalt.err (!%p421_p7)
}
  0x11   :  { %s498_s22 = smov 512   ;;  %s499_s23 = smov 32  }
  0x12   :  { %32 = dma.hbm_to_vmem [thread:$0]  %s573_s1, 8192, %s27_s13, [#allocation7], %s498_s22, %s498_s22, %s499_s23  }
  0x13   :  { %s500_s26 = smov [#allocation3]   ;;  %s501_s28 = smov [#allocation8]  }
  0x14   :  { %s17_s27 = sshll.u32 %s500_s26, 4  ;;  %s39_s29 = sshll.u32 %s501_s28, 4  ;;  %s18_s27 = int_to_ptr.vmem [resolvable:$true] %s17_s27  ;;  %s40_s29 = int_to_ptr.vmem [resolvable:$true] %s39_s29 }
  0x15   :  { %s425_s5 = scalar_lea.hbm %s572_s0, 128 }
  0x16   :  { %p426_p8 = scmp.ne.s32.totalorder %s572_s0, %s425_s5  ;;  %p429_p9 = scmp.lt.u32.totalorder %s425_s5, %s572_s0 }
  0x18   :  { %p431_p10 = pnand %p429_p9, %p426_p8 }
  0x1a   :  { %434 = shalt.err (!%p431_p10)
}
  0x1b   :  { %s435_s1 = scalar_lea.vmem %s18_s27, 128  ;;  %p440_p12 = scmp.lt.s32.totalorder %s18_s27, %s18_s27 }
  0x1c   :  { %p436_p11 = scmp.ne.s32.totalorder %s18_s27, %s435_s1  ;;  %p441_p13 = scmp.lt.s32.totalorder %s435_s1, %s435_s1 }
  0x1e   :  { %p442_p0 = por %p441_p13, %p440_p12 }
  0x20   :  { %p443_p1 = pnand %p442_p0, %p436_p11 }
  0x22   :  { %446 = shalt.err (!%p443_p1)
}
  0x23   :  { %20 = dma.hbm_to_vmem [thread:$0]  %s572_s0, 128, %s18_s27, [#allocation4]  }
  0x24   :  { %s447_s14 = scalar_lea.hbm %s574_s2, 64 }
  0x25   :  { %p448_p2 = scmp.ne.s32.totalorder %s574_s2, %s447_s14  ;;  %p451_p3 = scmp.lt.u32.totalorder %s447_s14, %s574_s2 }
  0x27   :  { %p453_p4 = pnand %p451_p3, %p448_p2 }
  0x29   :  { %456 = shalt.err (!%p453_p4)
}
  0x2a   :  { %s457_s19 = scalar_lea.vmem %s40_s29, 64  ;;  %p462_p6 = scmp.lt.s32.totalorder %s40_s29, %s40_s29 }
  0x2b   :  { %p458_p5 = scmp.ne.s32.totalorder %s40_s29, %s457_s19  ;;  %p463_p7 = scmp.lt.s32.totalorder %s457_s19, %s457_s19 }
  0x2d   :  { %p464_p8 = por %p463_p7, %p462_p6 }
  0x2f   :  { %p465_p9 = pnand %p464_p8, %p458_p5 }
  0x31   :  { %468 = shalt.err (!%p465_p9)
}
  0x32   :  { %42 = dma.hbm_to_vmem [thread:$0]  %s574_s2, 64, %s40_s29, [#allocation7]  }
  0x33   :  { %491 = dma.done.wait [#allocation4], 128  }
  0x34   :  { %492 = vsyncadd [#allocation4], 4294967168 }
  0x35   :  { %493 = dma.done.wait [#allocation7], 8256  }
  0x36   :  { %494 = vsyncadd [#allocation7], 4294959040  ;;  %v502_v0 = vmov 0.0   ;;  %v66_v1 = vld [vmem:[#allocation6 + $0x8] sm:$0xff]  ;;  %v65_v3 = vld [vmem:[#allocation6] sm:$0xff]  ;;  %s503_s2 = smov [#allocation9]  }
  0x37   :  { %193 = vmatprep.mubr.f32.mxu0 %v502_v0  ;;  %264 = vmatprep.mubr.f32.mxu1 %v502_v0  ;;  %v70_v2 = vld [vmem:[#allocation6 + $0x28] sm:$0xff]  ;;  %v69_v5 = vld [vmem:[#allocation6 + $0x20] sm:$0xff]  ;;  %v68_v6 = vld [vmem:[#allocation6 + $0x18] sm:$0xff]  ;;  %s322_s21 = sshll.u32 %s503_s2, 4  ;;  %s323_s21 = int_to_ptr.vmem [resolvable:$true] %s322_s21 }
  0x38   :  { %v332_v4 = vpack.c.bf16 %v70_v2, %v66_v1  ;;  %v72_v7 = vld [vmem:[#allocation6 + $0x38] sm:$0xff]  ;;  %v334_v8 = vpack.c.bf16 %v69_v5, %v65_v3  ;;  %v67_v10 = vld [vmem:[#allocation6 + $0x10] sm:$0xff]  ;;  %v74_v12 = vld [vmem:[#allocation6 + $0x48] sm:$0xff]  ;;  %s469_s22 = scalar_lea.vmem %s323_s21, 128  ;;  %p474_p11 = scmp.lt.s32.totalorder %s323_s21, %s323_s21 }
  0x39   :  { %v364_v9 = vpack.c.bf16 %v72_v7, %v68_v6  ;;  %v71_v11 = vld [vmem:[#allocation6 + $0x30] sm:$0xff]  ;;  %v78_v14 = vld [vmem:[#allocation6 + $0x68] sm:$0xff]  ;;  %v73_v15 = vld [vmem:[#allocation6 + $0x40] sm:$0xff]  ;;  %p470_p10 = scmp.ne.s32.totalorder %s323_s21, %s469_s22  ;;  %p475_p12 = scmp.lt.s32.totalorder %s469_s22, %s469_s22 }
  0x3a   :  { %333 = vmatprep.subr.bf16.mxu0 %v332_v4  ;;  %v366_v13 = vpack.c.bf16 %v71_v11, %v67_v10  ;;  %v77_v16 = vld [vmem:[#allocation6 + $0x60] sm:$0xff]  ;;  %v336_v17 = vpack.c.bf16 %v78_v14, %v74_v12  ;;  %v76_v19 = vld [vmem:[#allocation6 + $0x58] sm:$0xff]  ;;  %v75_v21 = vld [vmem:[#allocation6 + $0x50] sm:$0xff] }
  0x3b   :  { %335 = vmatpush1.bf16.msra.mxu0 %v334_v8  ;;  %365 = vmatprep.subr.bf16.mxu1 %v364_v9  ;;  %v338_v18 = vpack.c.bf16 %v77_v16, %v73_v15  ;;  %v80_v20 = vld [vmem:[#allocation6 + $0x78] sm:$0xff]  ;;  %v79_v23 = vld [vmem:[#allocation6 + $0x70] sm:$0xff]  ;;  %v82_v24 = vld [vmem:[#allocation6 + $0x88] sm:$0xff]  ;;  %p476_p13 = por %p475_p12, %p474_p11 }
  0x3c   :  { %367 = vmatpush1.bf16.msra.mxu1 %v366_v13  ;;  %v368_v22 = vpack.c.bf16 %v80_v20, %v76_v19  ;;  %v86_v25 = vld [vmem:[#allocation6 + $0xa8] sm:$0xff]  ;;  %337 = vmatprep.subr.bf16.mxu0 %v336_v17  ;;  %v370_v26 = vpack.c.bf16 %v79_v23, %v75_v21  ;;  %v81_v28 = vld [vmem:[#allocation6 + $0x80] sm:$0xff]  ;;  %v84_v30 = vld [vmem:[#allocation6 + $0x98] sm:$0xff] }
  0x3d   :  { %v340_v27 = vpack.c.bf16 %v86_v25, %v82_v24  ;;  %v85_v29 = vld [vmem:[#allocation6 + $0xa0] sm:$0xff]  ;;  %v88_v31 = vld [vmem:[#allocation6 + $0xb8] sm:$0xff]  ;;  %v83_v32 = vld [vmem:[#allocation6 + $0x90] sm:$0xff]  ;;  %p477_p0 = pnand %p476_p13, %p470_p10 }
  0x3e   :  { %369 = vmatprep.subr.bf16.mxu1 %v368_v22  ;;  %v87_v33 = vld [vmem:[#allocation6 + $0xb0] sm:$0xff]  ;;  %v342_v34 = vpack.c.bf16 %v85_v29, %v81_v28  ;;  %v372_v35 = vpack.c.bf16 %v88_v31, %v84_v30  ;;  %v90_v36 = vld [vmem:[#allocation6 + $0xc8] sm:$0xff]  ;;  %v89_v38 = vld [vmem:[#allocation6 + $0xc0] sm:$0xff] }
  0x3f   :  { %339 = vmatpush1.bf16.msra.mxu0 %v338_v18  ;;  %v94_v37 = vld [vmem:[#allocation6 + $0xe8] sm:$0xff]  ;;  %v374_v39 = vpack.c.bf16 %v87_v33, %v83_v32  ;;  %v93_v41 = vld [vmem:[#allocation6 + $0xe0] sm:$0xff]  ;;  %v92_v42 = vld [vmem:[#allocation6 + $0xd8] sm:$0xff] }
  0x40   :  { %371 = vmatpush1.bf16.msra.mxu1 %v370_v26  ;;  %341 = vmatprep.subr.bf16.mxu0 %v340_v27  ;;  %v344_v40 = vpack.c.bf16 %v94_v37, %v90_v36  ;;  %v96_v43 = vld [vmem:[#allocation6 + $0xf8] sm:$0xff]  ;;  %v91_v45 = vld [vmem:[#allocation6 + $0xd0] sm:$0xff]  ;;  %v98_v47 = vld [vmem:[#allocation6 + $0x108] sm:$0xff]  ;;  %v346_v49 = vpack.c.bf16 %v93_v41, %v89_v38 }
  0x41   :  { %373 = vmatprep.subr.bf16.mxu1 %v372_v35  ;;  %v376_v44 = vpack.c.bf16 %v96_v43, %v92_v42  ;;  %v95_v46 = vld [vmem:[#allocation6 + $0xf0] sm:$0xff]  ;;  %v102_v48 = vld [vmem:[#allocation6 + $0x128] sm:$0xff]  ;;  %v100_v50 = vld [vmem:[#allocation6 + $0x118] sm:$0xff] }
  0x42   :  { %v104_v51 = vld [vmem:[#allocation6 + $0x138] sm:$0xff]  ;;  %v378_v52 = vpack.c.bf16 %v95_v46, %v91_v45  ;;  %v348_v53 = vpack.c.bf16 %v102_v48, %v98_v47  ;;  %v97_v54 = vld [vmem:[#allocation6 + $0x100] sm:$0xff]  ;;  %v99_v56 = vld [vmem:[#allocation6 + $0x110] sm:$0xff] }
  0x43   :  { %343 = vmatpush1.bf16.msra.mxu0 %v342_v34  ;;  %v101_v55 = vld [vmem:[#allocation6 + $0x120] sm:$0xff]  ;;  %v380_v57 = vpack.c.bf16 %v104_v51, %v100_v50  ;;  %v103_v58 = vld [vmem:[#allocation6 + $0x130] sm:$0xff]  ;;  %v106_v59 = vld [vmem:[#allocation6 + $0x148] sm:$0xff]  ;;  %v288_v34 = vlaneseq }
  0x44   :  { %375 = vmatpush1.bf16.msra.mxu1 %v374_v39  ;;  %345 = vmatprep.subr.bf16.mxu0 %v344_v40  ;;  %v110_v60 = vld [vmem:[#allocation6 + $0x168] sm:$0xff]  ;;  %v108_v61 = vld [vmem:[#allocation6 + $0x158] sm:$0xff]  ;;  %v350_v63 = vpack.c.bf16 %v101_v55, %v97_v54  ;;  %v382_v0 = vpack.c.bf16 %v103_v58, %v99_v56  ;;  %v105_v2 = vld [vmem:[#allocation6 + $0x140] sm:$0xff] }
  0x45   :  { %377 = vmatprep.subr.bf16.mxu1 %v376_v44  ;;  %v112_v62 = vld [vmem:[#allocation6 + $0x178] sm:$0xff]  ;;  %v352_v1 = vpack.c.bf16 %v110_v60, %v106_v59  ;;  %v109_v3 = vld [vmem:[#allocation6 + $0x160] sm:$0xff]  ;;  %v107_v4 = vld [vmem:[#allocation6 + $0x150] sm:$0xff]  ;;  %v289_v35 = vshrl.u32 %v288_v34, 7 }
  0x46   :  { %v384_v5 = vpack.c.bf16 %v112_v62, %v108_v61  ;;  %v111_v6 = vld [vmem:[#allocation6 + $0x170] sm:$0xff]  ;;  %v114_v7 = vld [vmem:[#allocation6 + $0x188] sm:$0xff]  ;;  %v116_v9 = vld [vmem:[#allocation6 + $0x198] sm:$0xff]  ;;  %v354_v11 = vpack.c.bf16 %v109_v3, %v105_v2 }
  0x47   :  { %347 = vmatpush1.bf16.msra.mxu0 %v346_v49  ;;  %v118_v8 = vld [vmem:[#allocation6 + $0x1a8] sm:$0xff]  ;;  %v120_v10 = vld [vmem:[#allocation6 + $0x1b8] sm:$0xff]  ;;  %v386_v12 = vpack.c.bf16 %v111_v6, %v107_v4  ;;  %v113_v14 = vld [vmem:[#allocation6 + $0x180] sm:$0xff]  ;;  %v290_v36 = vsub.s32 0, %v289_v35  ;;  %v294_v38 = vsub.s32 1, %v289_v35  ;;  %v298_v39 = vsub.s32 2, %v289_v35 }
  0x48   :  { %379 = vmatpush1.bf16.msra.mxu1 %v378_v52  ;;  %349 = vmatprep.subr.bf16.mxu0 %v348_v53  ;;  %v356_v13 = vpack.c.bf16 %v118_v8, %v114_v7  ;;  %v117_v15 = vld [vmem:[#allocation6 + $0x1a0] sm:$0xff]  ;;  %v115_v16 = vld [vmem:[#allocation6 + $0x190] sm:$0xff]  ;;  %v388_v17 = vpack.c.bf16 %v120_v10, %v116_v9  ;;  %v122_v19 = vld [vmem:[#allocation6 + $0x1c8] sm:$0xff]  ;;  %v302_v43 = vsub.s32 3, %v289_v35 }
  0x49   :  { %381 = vmatprep.subr.bf16.mxu1 %v380_v57  ;;  %v119_v18 = vld [vmem:[#allocation6 + $0x1b0] sm:$0xff]  ;;  %v126_v20 = vld [vmem:[#allocation6 + $0x1e8] sm:$0xff]  ;;  %v124_v21 = vld [vmem:[#allocation6 + $0x1d8] sm:$0xff]  ;;  %v358_v23 = vpack.c.bf16 %v117_v15, %v113_v14 }
  0x4a   :  { %v128_v22 = vld [vmem:[#allocation6 + $0x1f8] sm:$0xff]  ;;  %v390_v24 = vpack.c.bf16 %v119_v18, %v115_v16  ;;  %v360_v25 = vpack.c.bf16 %v126_v20, %v122_v19  ;;  %v121_v26 = vld [vmem:[#allocation6 + $0x1c0] sm:$0xff]  ;;  %v123_v29 = vld [vmem:[#allocation6 + $0x1d0] sm:$0xff] }
  0x4b   :  { %351 = vmatpush1.bf16.msra.mxu0 %v350_v63  ;;  %v125_v27 = vld [vmem:[#allocation6 + $0x1e0] sm:$0xff]  ;;  %v392_v28 = vpack.c.bf16 %v128_v22, %v124_v21  ;;  %v127_v30 = vld [vmem:[#allocation6 + $0x1f0] sm:$0xff]  ;;  %v64_v33 = vld [vmem:[#allocation3] sm:$0xff] }
  0x4c   :  { %383 = vmatpush1.bf16.msra.mxu1 %v382_v0  ;;  %353 = vmatprep.subr.bf16.mxu0 %v352_v1  ;;  %v362_v31 = vpack.c.bf16 %v125_v27, %v121_v26  ;;  %v394_v32 = vpack.c.bf16 %v127_v30, %v123_v29  ;;  %v286_v37 = vld [vmem:[#allocation8] sm:$0xf] }
  0x4d   :  { %385 = vmatprep.subr.bf16.mxu1 %v384_v5  ;;  %v291_v40 = vrot.slane %v286_v37, %v290_v36  ;;  %v295_v41 = vrot.slane %v286_v37, %v294_v38  ;;  %v299_v42 = vrot.slane %v286_v37, %v298_v39  ;;  %v303_v51 = vrot.slane %v286_v37, %v302_v43 }
  0x4f   :  { %355 = vmatpush1.bf16.msra.mxu0 %v354_v11 }
  0x50   :  { %387 = vmatpush1.bf16.msra.mxu1 %v386_v12  ;;  %357 = vmatprep.subr.bf16.mxu0 %v356_v13 }
  0x51   :  { %389 = vmatprep.subr.bf16.mxu1 %v388_v17 }
  0x53   :  { %359 = vmatpush1.bf16.msra.mxu0 %v358_v23 }
  0x54   :  { %391 = vmatpush1.bf16.msra.mxu1 %v390_v24  ;;  %361 = vmatprep.subr.bf16.mxu0 %v360_v25 }
  0x55   :  { %393 = vmatprep.subr.bf16.mxu1 %v392_v28 }
  0x57   :  { %363 = vmatpush1.bf16.msra.mxu0 %v362_v31 }
  0x58   :  { %395 = vmatpush1.bf16.msra.mxu1 %v394_v32 }
  0x5a   :  { %194 = vmatmul.mubr.f32.vlgmr.msra.gmra.mrb[0].mxu0 %v64_v33 }
  0x5b   :  { %265 = vmatmul.mubr.f32.vlgmr.msra.gmra.mrb[0].mxu1 %v64_v33 }
 0x12d   :  { %v195_v44 = vpop.f32.mrb[0].mxu0 }
 0x12e   :  { %v308_v45 = vadd.f32 %v291_v40, %v195_v44  ;;  %v197_v46 = vpop.f32.mrb[1].mxu0  ;;  %v266_v47 = vpop.f32.mrb[0].mxu1 }
 0x12f   :  { %v309_v48 = vadd.f32 %v295_v41, %v197_v46  ;;  %v310_v49 = vadd.f32 %v299_v42, %v266_v47  ;;  %v268_v50 = vpop.f32.mrb[1].mxu1 }
 0x130   :  { %v311_v54 = vadd.f32 %v303_v51, %v268_v50 }
 0x131   :  { %v312_v52 = vmax.f32 %v308_v45, %v309_v48 }
 0x133   :  { %v313_v53 = vmax.f32 %v312_v52, %v310_v49 }
 0x135   :  { %v314_v55 = vmax.f32 %v313_v53, %v311_v54 }
 0x137   :  { %315 = vst [vmem:[#allocation9] sm:$0xff] %v314_v55 }
 0x138   :  { %480 = shalt.err (!%p477_p0)
}
 0x139   :  { %s481_s25 = scalar_lea.hbm %s575_s3, 128 }
 0x13a   :  { %p482_p1 = scmp.ne.s32.totalorder %s575_s3, %s481_s25  ;;  %p485_p2 = scmp.lt.u32.totalorder %s481_s25, %s575_s3 }
 0x13c   :  { %p487_p3 = pnand %p485_p2, %p482_p1 }
 0x13e   :  { %490 = shalt.err (!%p487_p3)
}
 0x13f   :  { %325 = dma.vmem_to_hbm [thread:$0]  %s323_s21, 128, %s575_s3, [#allocation5]  }
 0x140   :  { %495 = dma.done.wait [#allocation5], 128  }
 0x141   :  { %496 = vsyncadd [#allocation5], 4294967168 }
 0x142   :  { %329 = vsyncpa [#allocation4], 1 }
 0x143   :  { %330 = vsyncpa [#allocation7], 1 }
 0x144   :  { %331 = vsyncpa [#allocation5], 1 }

</bundles_post_ra>
